<compile_context>
chip_gen: v7x
topology: tpu7x:2x2x1
jax: 0.10.0
libtpu: 0.0.40
codegen_flags: <defaults>
</compile_context>

<pallas_src>
import functools

import jax
import jax.numpy as jnp
import numpy as np
from jax import lax
from jax.experimental import pallas as pl
from jax.experimental.pallas import tpu as pltpu


def _rotvq_kernel(emb_ref, emb_t_ref, prev_ref, tgt_ref, out_ref):
    """One (batch, T-tile) block of Householder-VQ quantization.

    emb_ref   : (K, N)  float32   pre-normalized codes, row 0 zeroed
    emb_t_ref : (N, K)  float32   transpose of the above
    prev_ref, tgt_ref, out_ref : (N, Tt)   one batch element, Tt time steps
    """
    emb = emb_ref[...]                                  # (K, N)
    emb_t = emb_t_ref[...]                              # (N, K)
    prev = prev_ref[...].astype(jnp.float32)            # (N, Tt)
    tgt = tgt_ref[...].astype(jnp.float32)              # (N, Tt)

    # <prev_t, tgt_t> per time step (sublane reduce over N).
    dot_pt = jnp.sum(prev * tgt, axis=0, keepdims=True)            # (1, Tt)

    # emb @ X (contract code_dim) -> (K, Tt); lane axis stays T (lane-dense).
    dn = (((1,), (0,)), ((), ()))
    pe = lax.dot_general(emb, prev, dn, preferred_element_type=jnp.float32)
    te = lax.dot_general(emb, tgt, dn, preferred_element_type=jnp.float32)

    eu = 2.0 - 2.0 * dot_pt + 4.0 * te * pe                        # (K, Tt)

    # argmin over codes (first-occurrence, torch semantics).
    K = eu.shape[0]
    k_ids = lax.broadcasted_iota(jnp.int32, eu.shape, 0)           # (K, Tt)
    min_val = jnp.min(eu, axis=0, keepdims=True)                   # (1, Tt)
    idx = jnp.min(jnp.where(eu == min_val, k_ids, K), axis=0, keepdims=True)

    enc = (k_ids == idx).astype(jnp.float32)                       # (K, Tt)

    # Selected code per time step: emb.T @ enc -> (N, Tt).
    sel = jnp.dot(emb_t, enc, preferred_element_type=jnp.float32)

    # proj_t = <prev_t, sel_t> = sum_k enc[k,t] * pe[k,t]  (reuses pe).
    proj = jnp.sum(enc * pe, axis=0, keepdims=True)                # (1, Tt)

    # Householder reflection: x - 2 (x . v) v
    out = prev - 2.0 * proj * sel
    out_ref[...] = out.astype(out_ref.dtype)


def _pick_t_tile(T):
    # Lane-dense tile (multiple of 128) when T allows it; otherwise take the
    # full T extent as a single block (always a legal block shape).
    if T % 128 == 0:
        for cand in (2048, 1024, 512, 256, 128):
            if T % cand == 0:
                return cand
    return T


@functools.partial(jax.jit, static_argnames=("num_code", "code_dim"))
def rotvq_forward(prev_input, target, rot_emb, *, num_code, code_dim):
    """prev_input, target: (B, N, T) with N == code_dim.  Returns (B, N, T)."""
    B, N, T = prev_input.shape
    assert N == code_dim
    K = num_code
    eps = jnp.finfo(jnp.float32).eps

    # Codebook normalization hoisted out of the kernel (done once; tiny K x N).
    emb = rot_emb.astype(jnp.float32)
    emb = emb * lax.rsqrt(jnp.sum(emb * emb, axis=-1, keepdims=True) + eps)
    emb = emb.at[0].set(0.0)            # first code := 0 vector
    emb_t = emb.T                       # (N, K)

    t_tile = _pick_t_tile(T)
    grid = (B, T // t_tile)

    # No wrapper transposes / pads: blocks are cut straight out of (B, N, T).
    x_spec = pl.BlockSpec((None, N, t_tile), lambda b, t: (b, 0, t))
    emb_spec = pl.BlockSpec((K, N), lambda b, t: (0, 0))
    emb_t_spec = pl.BlockSpec((N, K), lambda b, t: (0, 0))

    return pl.pallas_call(
        _rotvq_kernel,
        out_shape=jax.ShapeDtypeStruct((B, N, T), prev_input.dtype),
        grid=grid,
        in_specs=[emb_spec, emb_t_spec, x_spec, x_spec],
        out_specs=x_spec,
        compiler_params=pltpu.CompilerParams(
            dimension_semantics=("parallel", "parallel"),
        ),
    )(emb, emb_t, prev_input, target)


def rotvq_reference(prev_input, target, rot_emb, num_code):
    """Plain-JAX replica of the PyTorch forward, for verification."""
    eps = jnp.finfo(jnp.float32).eps
    B, N, T = prev_input.shape
    prev = jnp.swapaxes(prev_input, 1, 2).reshape(B * T, N)
    tgt = jnp.swapaxes(target, 1, 2).reshape(B * T, N)
    emb = rot_emb / jnp.sqrt(jnp.sum(rot_emb**2, axis=-1, keepdims=True) + eps)
    emb = jnp.concatenate([emb[:1] * 0.0, emb[1:]], axis=0)
    eu = 2.0 - 2.0 * jnp.sum(tgt * prev, axis=-1, keepdims=True)
    eu = eu + 4.0 * (tgt @ emb.T) * (prev @ emb.T)
    idx = jnp.argmin(eu, axis=-1)
    enc = jax.nn.one_hot(idx, num_code, dtype=jnp.float32)
    sel = enc @ emb
    quant = prev - 2.0 * jnp.sum(prev * sel, axis=-1, keepdims=True) * sel
    return jnp.swapaxes(quant.reshape(B, T, N), 1, 2)


if __name__ == "__main__":
    # Small shapes consistent with the module: B=2, code_dim=32, T=8, num_code=16.
    B, code_dim, T = 2, 32, 8
    num_code = 16

    key = jax.random.PRNGKey(0)
    k_prev, k_tgt, k_emb = jax.random.split(key, 3)
    prev_input = jax.random.normal(k_prev, (B, code_dim, T), dtype=jnp.float32)
    target = jax.random.normal(k_tgt, (B, code_dim, T), dtype=jnp.float32)
    # deterministic parameter init (stands in for nn.Parameter(torch.randn(...)))
    rot_emb = jax.random.normal(k_emb, (num_code, code_dim), dtype=jnp.float32)

    out = rotvq_forward(
        prev_input, target, rot_emb, num_code=num_code, code_dim=code_dim
    )
    out = jax.block_until_ready(out)

    ref = jax.block_until_ready(
        rotvq_reference(prev_input, target, rot_emb, num_code)
    )
    assert out.shape == (B, code_dim, T)
    np.testing.assert_allclose(np.asarray(out), np.asarray(ref), rtol=1e-5, atol=1e-5)

    print("KERNEL_OK")
</pallas_src>

<mosaic_0001>
module attributes {stable_mosaic.version = 11 : i64} {
  func.func @_rotvq_kernel(%arg0: i32, %arg1: i32, %arg2: memref<16x32xf32, #tpu.memory_space<vmem>>, %arg3: memref<32x16xf32, #tpu.memory_space<vmem>>, %arg4: memref<1x32x8xf32, #tpu.memory_space<vmem>>, %arg5: memref<1x32x8xf32, #tpu.memory_space<vmem>>, %arg6: memref<1x32x8xf32, #tpu.memory_space<vmem>>) attributes {dimension_semantics = [#tpu.dimension_semantics<parallel>, #tpu.dimension_semantics<parallel>], iteration_bounds = array<i64: 2, 1>, scalar_prefetch = 0 : i64, scratch_operands = 0 : i64, tpu.core_type = #tpu.core_type<tc>, window_params = [{pipeline_mode = #tpu.pipeline_mode<synchronous>, transform_indices = @transform_0, window_bounds = array<i64: 16, 32>}, {pipeline_mode = #tpu.pipeline_mode<synchronous>, transform_indices = @transform_1, window_bounds = array<i64: 32, 16>}, {transform_indices = @transform_2, window_bounds = array<i64: 1, 32, 8>}, {transform_indices = @transform_3, window_bounds = array<i64: 1, 32, 8>}, {transform_indices = @transform_4, window_bounds = array<i64: 1, 32, 8>}]} {
    %c0 = arith.constant 0 : index
    %c0_0 = arith.constant 0 : index
    %0 = vector.load %arg2[%c0, %c0_0] : memref<16x32xf32, #tpu.memory_space<vmem>>, vector<16x32xf32>
    %c0_1 = arith.constant 0 : index
    %c0_2 = arith.constant 0 : index
    %1 = vector.load %arg3[%c0_1, %c0_2] : memref<32x16xf32, #tpu.memory_space<vmem>>, vector<32x16xf32>
    %c0_3 = arith.constant 0 : index
    %c0_4 = arith.constant 0 : index
    %c0_5 = arith.constant 0 : index
    %2 = vector.load %arg4[%c0_3, %c0_4, %c0_5] : memref<1x32x8xf32, #tpu.memory_space<vmem>>, vector<1x32x8xf32>
    %3 = vector.shape_cast %2 : vector<1x32x8xf32> to vector<32x8xf32>
    %c0_6 = arith.constant 0 : index
    %c0_7 = arith.constant 0 : index
    %c0_8 = arith.constant 0 : index
    %4 = vector.load %arg5[%c0_6, %c0_7, %c0_8] : memref<1x32x8xf32, #tpu.memory_space<vmem>>, vector<1x32x8xf32>
    %5 = vector.shape_cast %4 : vector<1x32x8xf32> to vector<32x8xf32>
    %6 = arith.mulf %3, %5 : vector<32x8xf32>
    %cst = arith.constant dense<0.000000e+00> : vector<8xf32>
    %7 = vector.multi_reduction <add>, %6, %cst [0] : vector<32x8xf32> to vector<8xf32>
    %8 = vector.shape_cast %7 : vector<8xf32> to vector<1x8xf32>
    %cst_9 = arith.constant dense<0.000000e+00> : vector<16x8xf32>
    %9 = tpu.matmul %0, %3, %cst_9 {dimension_numbers = #tpu.dot_dimension_numbers<[1], [0], [0], [1], [0, 0, 1, 1], [], []>} : vector<16x32xf32>, vector<32x8xf32>, vector<16x8xf32> -> vector<16x8xf32>
    %cst_10 = arith.constant dense<0.000000e+00> : vector<16x8xf32>
    %10 = tpu.matmul %0, %5, %cst_10 {dimension_numbers = #tpu.dot_dimension_numbers<[1], [0], [0], [1], [0, 0, 1, 1], [], []>} : vector<16x32xf32>, vector<32x8xf32>, vector<16x8xf32> -> vector<16x8xf32>
    %cst_11 = arith.constant 2.000000e+00 : f32
    %11 = vector.broadcast %cst_11 : f32 to vector<1x8xf32>
    %12 = arith.mulf %11, %8 : vector<1x8xf32>
    %cst_12 = arith.constant 2.000000e+00 : f32
    %13 = vector.broadcast %cst_12 : f32 to vector<1x8xf32>
    %14 = arith.subf %13, %12 : vector<1x8xf32>
    %cst_13 = arith.constant 4.000000e+00 : f32
    %15 = vector.broadcast %cst_13 : f32 to vector<16x8xf32>
    %16 = arith.mulf %15, %10 : vector<16x8xf32>
    %17 = arith.mulf %16, %9 : vector<16x8xf32>
    %18 = vector.broadcast %14 : vector<1x8xf32> to vector<16x8xf32>
    %19 = arith.addf %18, %17 : vector<16x8xf32>
    %20 = tpu.iota {dimensions = array<i32: 0>} : vector<16x8xi32>
    %cst_14 = arith.constant dense<0x7F800000> : vector<8xf32>
    %21 = vector.multi_reduction <minimumf>, %19, %cst_14 [0] : vector<16x8xf32> to vector<8xf32>
    %22 = vector.shape_cast %21 : vector<8xf32> to vector<1x8xf32>
    %23 = vector.broadcast %22 : vector<1x8xf32> to vector<16x8xf32>
    %24 = arith.cmpf oeq, %19, %23 : vector<16x8xf32>
    %c16_i32 = arith.constant 16 : i32
    %25 = vector.broadcast %c16_i32 : i32 to vector<16x8xi32>
    %26 = arith.select %24, %20, %25 : vector<16x8xi1>, vector<16x8xi32>
    %cst_15 = arith.constant dense<2147483647> : vector<8xi32>
    %27 = vector.multi_reduction <minsi>, %26, %cst_15 [0] : vector<16x8xi32> to vector<8xi32>
    %28 = vector.shape_cast %27 : vector<8xi32> to vector<1x8xi32>
    %29 = vector.broadcast %28 : vector<1x8xi32> to vector<16x8xi32>
    %30 = arith.cmpi eq, %20, %29 : vector<16x8xi32>
    %31 = arith.extui %30 : vector<16x8xi1> to vector<16x8xi32>
    %32 = arith.sitofp %31 : vector<16x8xi32> to vector<16x8xf32>
    %cst_16 = arith.constant dense<0.000000e+00> : vector<32x8xf32>
    %33 = tpu.matmul %1, %32, %cst_16 {dimension_numbers = #tpu.dot_dimension_numbers<[1], [0], [0], [1], [0, 0, 1, 1], [], []>} : vector<32x16xf32>, vector<16x8xf32>, vector<32x8xf32> -> vector<32x8xf32>
    %34 = arith.mulf %32, %9 : vector<16x8xf32>
    %cst_17 = arith.constant dense<0.000000e+00> : vector<8xf32>
    %35 = vector.multi_reduction <add>, %34, %cst_17 [0] : vector<16x8xf32> to vector<8xf32>
    %36 = vector.shape_cast %35 : vector<8xf32> to vector<1x8xf32>
    %cst_18 = arith.constant 2.000000e+00 : f32
    %37 = vector.broadcast %cst_18 : f32 to vector<1x8xf32>
    %38 = arith.mulf %37, %36 : vector<1x8xf32>
    %39 = vector.broadcast %38 : vector<1x8xf32> to vector<32x8xf32>
    %40 = arith.mulf %39, %33 : vector<32x8xf32>
    %41 = arith.subf %3, %40 : vector<32x8xf32>
    %c0_19 = arith.constant 0 : index
    %c0_20 = arith.constant 0 : index
    %c0_21 = arith.constant 0 : index
    %42 = vector.load %arg6[%c0_19, %c0_20, %c0_21] : memref<1x32x8xf32, #tpu.memory_space<vmem>>, vector<1x32x8xf32>
    %43 = vector.shape_cast %42 : vector<1x32x8xf32> to vector<32x8xf32>
    %44 = vector.shape_cast %41 : vector<32x8xf32> to vector<1x32x8xf32>
    tpu.vector_store %arg6[%c0_19, %c0_20, %c0_21], %44 {strides = array<i32>} : memref<1x32x8xf32, #tpu.memory_space<vmem>>, vector<1x32x8xf32>,
    return
  }
  func.func @transform_0(%arg0: i32, %arg1: i32) -> (i32, i32) {
    %c0_i32 = arith.constant 0 : i32
    %c0_i32_0 = arith.constant 0 : i32
    %c0_i32_1 = arith.constant 0 : i32
    return %c0_i32, %c0_i32_0 : i32, i32
  }
  func.func @transform_1(%arg0: i32, %arg1: i32) -> (i32, i32) {
    %c0_i32 = arith.constant 0 : i32
    %c0_i32_0 = arith.constant 0 : i32
    %c0_i32_1 = arith.constant 0 : i32
    return %c0_i32, %c0_i32_0 : i32, i32
  }
  func.func @transform_2(%arg0: i32, %arg1: i32) -> (i32, i32, i32) {
    %c0_i32 = arith.constant 0 : i32
    %c0_i32_0 = arith.constant 0 : i32
    return %arg0, %c0_i32, %arg1 : i32, i32, i32
  }
  func.func @transform_3(%arg0: i32, %arg1: i32) -> (i32, i32, i32) {
    %c0_i32 = arith.constant 0 : i32
    %c0_i32_0 = arith.constant 0 : i32
    return %arg0, %c0_i32, %arg1 : i32, i32, i32
  }
  func.func @transform_4(%arg0: i32, %arg1: i32) -> (i32, i32, i32) {
    %c0_i32 = arith.constant 0 : i32
    %c0_i32_0 = arith.constant 0 : i32
    return %arg0, %c0_i32, %arg1 : i32, i32, i32
  }
}

</mosaic_0001>

<bundles_post_ra>
// kernel: rotvq_forward.1
= control target key start
LH: loop header
LB: loop body
LE: loop exit
PB: predicated region body
PF: predicated region fallthrough
CT: control target
= control target key end

     0   :  { %s892_s15 = smov 0   ;;  %s894_s16 = smov 0   ;;  %s993_s0 = inlined_call_operand.vmem [shape: f32[16,32], index: 0, kind: input, shape index: {}]   ;;  %s994_s1 = inlined_call_operand.vmem [shape: f32[32,16], index: 1, kind: input, shape index: {}]   ;;  %s995_s2 = inlined_call_operand.vmem [shape: f32[2,32,8], index: 2, kind: input, shape index: {}]   ;;  %s996_s3 = inlined_call_operand.vmem [shape: f32[2,32,8], index: 3, kind: input, shape index: {}]   ;;  %s997_s4 = inlined_call_operand.vmem [shape: f32[2,32,8], index: 4, kind: output, shape index: {}]  }
   0x1   :  { %s896_s17 = smov 0  }
   0x2 LB: > { %s26_s18 = sadd.s32 1, %s859_s16  ;;  %p719_p0 = scmp.ge.s32.totalorder %s863_s17, 1  ;;  %s863_s17 = sphi %s896_s17, %s14_s17   ;;  %s859_s16 = sphi %s894_s16, %s999_s16   ;;  %s855_s15 = sphi %s892_s15, %s998_s15  }
   0x3   : > { %p28_p1 = scmp.ge.s32.totalorder %s26_s18, 2  ;;  %p196_p2 = scmp.lt.s32.totalorder %s863_s17, 3 }
   0x5   : > { %s1001_s18 = smov (%p28_p1, %s26_s18), 0  ;;  %p197_p3 = pnand %p719_p0, %p196_p2 }
   0x6   : > { %p236_p4 = scmp.lt.s32.totalorder (!%p197_p3), %s855_s15, 1  ;;  %v260_v0 = vld [vmem:[%s993_s0] sm:$0xff] (!%p197_p3)  ;;  %vm292_vm0 = vcmask (!%p197_p3), 261120   ;;  %vm278_vm1 = vcmask (!%p197_p3), 64512   ;;  %v261_v23 = vld [vmem:[%s993_s0 + $0x8] sm:$0xff] (!%p197_p3)  ;;  %vm492_vm2 = vcmask (!%p197_p3), 130048   ;;  %v457_v49 = vlaneseq (!%p197_p3) }
   0x7   : > { %200 = sbr.rel (%p197_p3) target bundleno = 504 (0x1f8), region = 36  ;;  %780 = vmatprep.mubr.msk.f32.mxu1 (!%p197_p3), %vm292_vm0, %v260_v0  ;;  %769 = vmatprep.mubr.msk.f32.mxu0 (!%p197_p3), %vm292_vm0, %v260_v0  ;;  %v262_v25 = vld [vmem:[%s994_s1] sm:$0xff] (!%p197_p3)  ;;  %v264_v26 = vld [vmem:[%s994_s1 + $0x10] sm:$0xff] (!%p197_p3) }
   0x8   : > { %v458_v52 = vshrl.u32 (!%p197_p3), %v457_v49, 7 }
   0xa   : > { %v459_v55 = vadd.s32 (!%p197_p3), 8, %v458_v52 }
   0xe   : > { %s1003_s15 = smov (!%p236_p4, %s855_s15), 1 }
   0xf   : > { %s915_s21 = sshll.u32 %s1003_s15, 5 }
  0x10   : > { %s243_s24 = scalar_lea.vmem %s995_s2, %s915_s21  ;;  %s251_s27 = scalar_lea.vmem %s996_s3, %s915_s21 }
  0x11   : > { %v925_v1 = vld [vmem:[%s243_s24] sm:$0xff]  ;;  %v927_v2 = vld [vmem:[%s243_s24 + $0x8] sm:$0xff]  ;;  %v932_v7 = vld [vmem:[%s243_s24 + $0x10] sm:$0xff]  ;;  %s259_s14 = scalar_lea.vmem %s997_s4, %s915_s21 }
  0x12   : > { %v270_v3 = vld [vmem:[%s251_s27] sm:$0xff]  ;;  %v271_v4 = vld [vmem:[%s251_s27 + $0x8] sm:$0xff]  ;;  %v793_v6 = vpack.c.bf16 %v927_v2, %v925_v1  ;;  %v934_v8 = vld [vmem:[%s243_s24 + $0x18] sm:$0xff] }
  0x13   : > { %v274_v5 = vmul.f32 %v270_v3, %v925_v1  ;;  %v275_v9 = vmul.f32 %v271_v4, %v927_v2  ;;  %v801_v10 = vpack.c.bf16 %v271_v4, %v270_v3  ;;  %v272_v11 = vld [vmem:[%s251_s27 + $0x10] sm:$0xff]  ;;  %v273_v12 = vld [vmem:[%s251_s27 + $0x18] sm:$0xff]  ;;  %v797_v13 = vpack.c.bf16 %v934_v8, %v932_v7 }
  0x14   : > { %794 = vmatprep.subr.bf16.mxu0 %v793_v6  ;;  %v276_v15 = vmul.f32 %v272_v11, %v932_v7  ;;  %v277_v16 = vmul.f32 %v273_v12, %v934_v8  ;;  %v805_v17 = vpack.c.bf16 %v273_v12, %v272_v11  ;;  %v866_v12 = vmov 1.0|1.0  }
  0x15   : > { %v279_v14 = vsel %vm278_vm1, %v274_v5, 0.0  ;;  %v280_v18 = vsel %vm278_vm1, %v275_v9, 0.0  ;;  %802 = vmatprep.subr.bf16.mxu1 %v801_v10  ;;  %796 = vmatpush3.bf16.msra.mxu0 %v793_v6  ;;  %v865_v6 = vmov 0.0  }
  0x16   : > { %v281_v19 = vadd.f32 %v280_v18, %v279_v14  ;;  %804 = vmatpush3.bf16.msra.mxu1 %v801_v10  ;;  %v282_v20 = vsel %vm278_vm1, %v276_v15, 0.0  ;;  %798 = vmatprep.subr.bf16.mxu0 %v797_v13  ;;  %v284_v21 = vsel %vm278_vm1, %v277_v16, 0.0  ;;  %v263_v14 = vld [vmem:[%s994_s1 + $0x8] sm:$0xff]  ;;  %v265_v15 = vld [vmem:[%s994_s1 + $0x18] sm:$0xff] }
  0x17   : > { %806 = vmatprep.subr.bf16.mxu1 %v805_v17 }
  0x18   : > { %v283_v22 = vadd.f32 %v282_v20, %v281_v19 }
  0x19   : > { %800 = vmatpush3.bf16.msra.mxu0 %v797_v13 }
  0x1a   : > { %v285_v24 = vadd.f32 %v284_v21, %v283_v22  ;;  %808 = vmatpush3.bf16.msra.mxu1 %v805_v17 }
  0x1c   : > { %770 = vmatmul.mubr.msk.f32.vlgmr.msra.gmra.mrb[0].mxu0 %vm292_vm0, %v261_v23  ;;  %v286_v27 = vrot.slane %v285_v24, 4 }
  0x1d   : > { %781 = vmatmul.mubr.msk.f32.vlgmr.msra.gmra.mrb[0].mxu1 %vm292_vm0, %v261_v23  ;;  %787 = vmatprep.mubr.msk.f32.mxu0 %vm492_vm2, %v262_v25 }
  0x1e   : > { %790 = vmatprep.mubr.msk.f32.mxu1 %vm492_vm2, %v264_v26  ;;  %v287_v28 = vadd.f32 %v286_v27, %v285_v24 }
  0x20   : > { %v288_v29 = vrot.slane %v287_v28, 2 }
  0x22   : > { %v289_v30 = vadd.f32 %v288_v29, %v287_v28 }
  0x24   : > { %v290_v31 = vrot.slane %v289_v30, 1 }
  0x26   : > { %v291_v32 = vadd.f32 %v290_v31, %v289_v30 }
  0x28   : > { %v449_v33 = vmul.f32 2.0, %v291_v32 }
  0x2a   : > { %v450_v38 = vsub.f32 2.0, %v449_v33 }
  0xef   : > { %v771_v34 = vpop.f32.mrb[0].mxu0 }
  0xf0   : > { %v782_v35 = vpop.f32.mrb[0].mxu1  ;;  %v365_v36 = vpop.f32.mrb[1].mxu0 }
  0xf1   : > { %v452_v37 = vmul.f32 4.0, %v782_v35  ;;  %v440_v39 = vpop.f32.mrb[1].mxu1 }
  0xf2   : > { %v451_v40 = vmul.f32 4.0, %v440_v39 }
  0xf3   : > { %v454_v41 = vmul.f32 %v771_v34, %v452_v37 }
  0xf4   : > { %v453_v42 = vmul.f32 %v451_v40, %v365_v36 }
  0xf5   : > { %v456_v43 = vadd.f32 %v454_v41, %v450_v38 }
  0xf6   : > { %v455_v44 = vadd.f32 %v453_v42, %v450_v38 }
  0xf7   : > { %v461_v45 = vsel %vm278_vm1, %v456_v43, inf }
  0xf8   : > { %v460_v46 = vsel %vm278_vm1, %v455_v44, inf }
  0xf9   : > { %v462_v47 = vmin.f32 %v460_v46, %v461_v45 }
  0xfb   : > { %v463_v48 = vrot.slane %v462_v47, 4 }
  0xfd   : > { %v464_v50 = vmin.f32 %v462_v47, %v463_v48 }
  0xff   : > { %v465_v51 = vrot.slane %v464_v50, 2 }
 0x101   : > { %v466_v53 = vmin.f32 %v464_v50, %v465_v51 }
 0x103   : > { %v467_v54 = vrot.slane %v466_v53, 1 }
 0x105   : > { %v468_v56 = vmin.f32 %v466_v53, %v467_v54 }
 0x107   : > { %vm469_vm3 = vcmp.eq.f32.partialorder %v455_v44, %v468_v56  ;;  %vm470_vm4 = vcmp.eq.f32.partialorder %v456_v43, %v468_v56 }
 0x108   : > { %v471_v57 = vsel %vm469_vm3, %v458_v52, 16  ;;  %v472_v58 = vsel %vm470_vm4, %v459_v55, 16 }
 0x109   : > { %v473_v59 = vsel %vm278_vm1, %v471_v57, 2147483647  ;;  %v474_v60 = vsel %vm278_vm1, %v472_v58, 2147483647 }
 0x10a   : > { %vm475_vm5 = vcmp.lt.s32.totalorder %v473_v59, %v474_v60 }
 0x10b   : > { %v476_v61 = vsel %vm475_vm5, %v473_v59, %v474_v60 }
 0x10c   : > { %v477_v62 = vrot.slane %v476_v61, 4 }
 0x10e   : > { %vm478_vm6 = vcmp.lt.s32.totalorder %v476_v61, %v477_v62 }
 0x10f   : > { %v479_v63 = vsel %vm478_vm6, %v476_v61, %v477_v62 }
 0x110   : > { %v480_v0 = vrot.slane %v479_v63, 2 }
 0x112   : > { %vm481_vm7 = vcmp.lt.s32.totalorder %v479_v63, %v480_v0 }
 0x113   : > { %v482_v3 = vsel %vm481_vm7, %v479_v63, %v480_v0 }
 0x114   : > { %v483_v4 = vrot.slane %v482_v3, 1 }
 0x116   : > { %vm484_vm8 = vcmp.lt.s32.totalorder %v482_v3, %v483_v4 }
 0x117   : > { %v485_v5 = vsel %vm484_vm8, %v482_v3, %v483_v4 }
 0x118   : > { %vm486_vm9 = vcmp.eq.s32.totalorder %v458_v52, %v485_v5  ;;  %vm487_vm10 = vcmp.eq.s32.totalorder %v459_v55, %v485_v5 }
 0x119   : > { %v730_v9 = vsel %vm486_vm9, 1.0, %v865_v6  ;;  %v731_v10 = vsel %vm487_vm10, 1.0, %v865_v6  ;;  %vm809_vm11 = vmpackc.low %vm487_vm10, %vm486_vm9 }
 0x11a   : > { %v590_v11 = vmul.f32 %v730_v9, %v365_v36  ;;  %810 = vmatprep.subr.msk.bf16.mxu0 %vm809_vm11, %v866_v12  ;;  %v591_v13 = vmul.f32 %v771_v34, %v731_v10  ;;  %813 = vmatprep.subr.msk.bf16.mxu1 %vm809_vm11, %v866_v12 }
 0x11b   : > { %812 = vmatpush3.bf16.msk.msra.mxu0 %vm809_vm11, %v866_v12  ;;  %814 = vmatpush3.bf16.msk.msra.mxu1 %vm809_vm11, %v866_v12 }
 0x11c   : > { %v592_v16 = vsel %vm278_vm1, %v590_v11, 0.0  ;;  %v593_v17 = vsel %vm278_vm1, %v591_v13, 0.0 }
 0x11d   : > { %v594_v18 = vadd.f32 %v593_v17, %v592_v16 }
 0x11e   : > { %788 = vmatmul.mubr.msk.f32.vlgmr.msra.gmra.mrb[2].mxu0 %vm492_vm2, %v263_v14  ;;  %791 = vmatmul.mubr.msk.f32.vlgmr.msra.gmra.mrb[2].mxu1 %vm492_vm2, %v265_v15 }
 0x11f   : > { %v595_v19 = vrot.slane %v594_v18, 4 }
 0x121   : > { %v596_v20 = vadd.f32 %v595_v19, %v594_v18 }
 0x123   : > { %v597_v21 = vrot.slane %v596_v20, 2 }
 0x125   : > { %v598_v22 = vadd.f32 %v597_v21, %v596_v20 }
 0x127   : > { %v599_v23 = vrot.slane %v598_v22, 1 }
 0x129   : > { %v600_v24 = vadd.f32 %v599_v23, %v598_v22 }
 0x12b   : > { %v601_v25 = vmul.f32 2.0, %v600_v24 }
 0x1f1   : > { %v789_v26 = vpop.f32.mrb[2].mxu0  ;;  %v792_v27 = vpop.f32.mrb[2].mxu1 }
 0x1f2   : > { %v603_v28 = vmul.f32 %v789_v26, %v601_v25  ;;  %v605_v29 = vmul.f32 %v792_v27, %v601_v25  ;;  %v571_v30 = vpop.f32.mrb[3].mxu0  ;;  %v581_v31 = vpop.f32.mrb[3].mxu1 }
 0x1f3   : > { %v602_v32 = vmul.f32 %v601_v25, %v571_v30  ;;  %v604_v33 = vmul.f32 %v601_v25, %v581_v31 }
 0x1f4   : > { %v607_v34 = vsub.f32 %v927_v2, %v603_v28  ;;  %v609_v35 = vsub.f32 %v934_v8, %v605_v29 }
 0x1f5   : > { %v606_v36 = vsub.f32 %v925_v1, %v602_v32  ;;  %v608_v37 = vsub.f32 %v932_v7, %v604_v33 }
 0x1f6   : > { %611 = vst.msk [vmem:[%s259_s14 + $0x8] sm:$0xff] %vm278_vm1, %v607_v34  ;;  %613 = vst.msk [vmem:[%s259_s14 + $0x18] sm:$0xff] %vm278_vm1, %v609_v35 }
 0x1f7   : > { %610 = vst.msk [vmem:[%s259_s14] sm:$0xff] %vm278_vm1, %v606_v36  ;;  %612 = vst.msk [vmem:[%s259_s14 + $0x10] sm:$0xff] %vm278_vm1, %v608_v37 }
 0x1f8 PF: > { %s14_s17 = sadd.s32 1, %s863_s17   ;;  %s998_s15 = smov %s859_s16 }
 0x1f9   : > { %p11_p5 = scmp.ge.s32.totalorder %s14_s17, 4   ;;  %s999_s16 = smov %s1001_s18 }
 0x1fb   :  { %13 = sbr.rel (!%p11_p5) target bundleno = 2 (0x2), region = 69 }

</bundles_post_ra>
